<compile_context>
chip_gen: v6e
topology: v6e:2x2x1
jax: 0.10.0
libtpu: 0.0.40
codegen_flags: <defaults>
</compile_context>

<pallas_src>
import functools
import math

import jax
import jax.numpy as jnp
from jax import lax
from jax.experimental import pallas as pl
from jax.experimental.pallas import tpu as pltpu


_VMEM_BUDGET = 48 * 1024 * 1024        # fits v7x's 64 MiB physical VMEM with headroom
_SMALL_TABLE_BYTES = 8 * 1024 * 1024   # table kept resident in VMEM below this
_SMALL_TABLE_VOCAB = 4096              # bounds the one-hot matmul FLOPs
_CHUNK = 32                            # rows per gather wave (<= 2*_CHUNK DMAs in flight)


def _round_up(x: int, m: int) -> int:
    return (x + m - 1) // m * m


def _cdiv(a: int, b: int) -> int:
    return (a + b - 1) // b


def _pick_tile(n: int, block_tokens: int, granule: int,
               per_token_bytes: int, fixed_bytes: int) -> int:
    """Largest tile (multiple of `granule`) fitting the VMEM budget; then split so the
    grid has >= 2 steps when possible (v7x: 'parallel' axis shards across 2 TCs)."""
    cap = max(granule, ((_VMEM_BUDGET - fixed_bytes) // per_token_bytes) // granule * granule)
    t = min(_round_up(block_tokens, granule), _round_up(n, granule), cap)
    if _cdiv(n, t) < 2 and t > granule:
        t = max(granule, _round_up(_cdiv(n, 2), granule))
    return t


def _vmem_limit(bytes_needed: int) -> int:
    return int(min(max(bytes_needed + (4 << 20), 16 << 20), 56 << 20))


# ---------------------------------------------------------------------------------
# Fast path: table resident in VMEM, gather == one-hot matmul on the MXU.
# ---------------------------------------------------------------------------------
def _embed_onehot_kernel(ids_ref, emb_ref, out_ref, *, vocab: int, scale: float):
    ids = ids_ref[...]                                              # (t, 1) int32
    iota = lax.broadcasted_iota(jnp.int32, (ids.shape[0], vocab), 1)
    onehot = (iota == ids).astype(emb_ref.dtype)                    # (t, vocab)
    rows = jnp.dot(onehot, emb_ref[...], preferred_element_type=jnp.float32)
    out_ref[...] = (rows * scale).astype(out_ref.dtype)             # (t, d_model)


# ---------------------------------------------------------------------------------
# General path: table stays in HBM; chunked, double-buffered manual row gather.
# ---------------------------------------------------------------------------------
def _embed_gather_kernel(ids_ref, emb_hbm, out_ref, buf, sem, *,
                         tokens_per_tile: int, chunk: int, scale: float):
    tile = pl.program_id(0)
    base = pl.multiple_of(tile * tokens_per_tile, chunk)
    n_chunks = tokens_per_tile // chunk

    def issue(c: int):
        slot = c % 2
        cbase = base + c * chunk

        def body(r, carry):
            tok = ids_ref[cbase + r]
            pltpu.make_async_copy(emb_hbm.at[tok], buf.at[slot, r], sem.at[slot]).start()
            return carry

        lax.fori_loop(0, chunk, body, 0, unroll=8)

    issue(0)
    # Static (unrolled) loop over waves: wave c+1's DMAs are in flight while wave c is
    # waited, scaled and stored, so the DMA engine never idles behind the epilogue.
    for c in range(n_chunks):
        slot = c % 2
        if c + 1 < n_chunks:
            issue(c + 1)
        # One aggregate wait retires all `chunk` row copies of this wave: DMA semaphores
        # count bytes, and this descriptor's byte count equals the wave's total. (Only
        # .wait() is called, so the src/dst of the descriptor are just a size template.)
        pltpu.make_async_copy(buf.at[slot], buf.at[slot], sem.at[slot]).wait()
        # Scale in the table's native dtype (bf16-native on v6e/v7x), lane-dense store.
        out_ref[pl.ds(c * chunk, chunk), :] = (buf[slot] * scale).astype(out_ref.dtype)


# ---------------------------------------------------------------------------------
# Wrapper
# ---------------------------------------------------------------------------------
def input_embeddings(x, embedding_table, *, block_tokens: int = 512,
                     table_in_vmem: bool | None = None):
    """Pallas TPU equivalent of InputEmbeddings.forward: table[x] * sqrt(d_model).

    x: integer token ids (any shape); embedding_table: (vocab, d_model).
    Returns x.shape + (d_model,) in the table's dtype.
    """
    vocab, d_model = embedding_table.shape
    lead_shape = tuple(int(s) for s in x.shape)
    n = int(math.prod(lead_shape)) if lead_shape else 1
    dtype = embedding_table.dtype
    isz = jnp.dtype(dtype).itemsize
    table_bytes = vocab * d_model * isz
    scale = float(math.sqrt(d_model))

    # Clamp ids (nn.Embedding would raise on OOB); also keeps the HBM row gather from
    # ever reading arbitrary memory.
    ids = jnp.clip(x.reshape(n).astype(jnp.int32), 0, vocab - 1)

    if table_in_vmem is None:
        table_in_vmem = table_bytes <= _SMALL_TABLE_BYTES and vocab <= _SMALL_TABLE_VOCAB

    if table_in_vmem:
        # -------- fast path: one-hot MXU gather from a VMEM-resident table --------
        per_tok = 2 * d_model * isz + vocab * 4 + d_model * 4 + 4
        t = _pick_tile(n, block_tokens, 8, per_tok, 2 * table_bytes)
        n_pad = _round_up(n, t)
        ids2d = jnp.pad(ids, (0, n_pad - n)).reshape(n_pad, 1)

        kernel = functools.partial(_embed_onehot_kernel, vocab=vocab, scale=scale)
        out_flat = pl.pallas_call(
            kernel,
            out_shape=jax.ShapeDtypeStruct((n_pad, d_model), dtype),
            grid=(n_pad // t,),
            in_specs=[pl.BlockSpec((t, 1), lambda i: (i, 0)),
                      pl.BlockSpec((vocab, d_model), lambda i: (0, 0))],
            out_specs=pl.BlockSpec((t, d_model), lambda i: (i, 0)),
            compiler_params=pltpu.CompilerParams(
                dimension_semantics=("parallel",),
                vmem_limit_bytes=_vmem_limit(2 * table_bytes + t * per_tok)),
            cost_estimate=pl.CostEstimate(
                flops=2 * n_pad * vocab * d_model + n_pad * d_model,
                transcendentals=0,
                bytes_accessed=table_bytes + n_pad * 4 + n_pad * d_model * isz),
        )(ids2d, embedding_table)
    else:
        # -------- general path: chunked, double-buffered HBM row gather --------
        chunk = _CHUNK
        per_tok = 2 * d_model * isz                    # double-buffered output block
        t = _pick_tile(n, block_tokens, chunk, per_tok, 2 * chunk * d_model * isz)
        n_pad = _round_up(n, t)
        # TODO(synk): ids are scalar-prefetched into SMEM as int32[n_pad]; for very
        # large batch*seq (>~64K tokens) chunk the call at the host level instead.
        ids_pad = jnp.pad(ids, (0, n_pad - n))         # padded tokens gather row 0

        kernel = functools.partial(_embed_gather_kernel, tokens_per_tile=t,
                                   chunk=chunk, scale=scale)
        grid_spec = pltpu.PrefetchScalarGridSpec(
            num_scalar_prefetch=1,                          # ids -> SMEM
            grid=(n_pad // t,),
            in_specs=[pl.BlockSpec(memory_space=pl.ANY)],   # table stays in HBM
            out_specs=pl.BlockSpec((t, d_model), lambda i, ids: (i, 0)),
            scratch_shapes=[
                pltpu.VMEM((2, chunk, d_model), dtype),     # double-buffered gather waves
                pltpu.SemaphoreType.DMA((2,)),              # one DMA semaphore per wave slot
            ],
        )
        out_flat = pl.pallas_call(
            kernel,
            out_shape=jax.ShapeDtypeStruct((n_pad, d_model), dtype),
            grid_spec=grid_spec,
            compiler_params=pltpu.CompilerParams(
                dimension_semantics=("parallel",),
                vmem_limit_bytes=_vmem_limit(t * per_tok + 2 * chunk * d_model * isz)),
            cost_estimate=pl.CostEstimate(
                flops=n_pad * d_model,
                transcendentals=0,
                bytes_accessed=n_pad * 4 + 2 * n_pad * d_model * isz),
        )(ids_pad, embedding_table)

    return out_flat[:n].reshape(*lead_shape, d_model)


if __name__ == "__main__":
    batch, seq = 2, 64
    d_model, vocab_size = 128, 256

    key = jax.random.PRNGKey(0)
    k_emb, k_ids = jax.random.split(key)

    # Deterministic stand-in for nn.Embedding's N(0, 1) weight init.
    embedding_table = jax.random.normal(k_emb, (vocab_size, d_model), dtype=jnp.float32)
    x = jax.random.randint(k_ids, (batch, seq), 0, vocab_size, dtype=jnp.int32)

    # 1) Small-table fast path (VMEM-resident table, one-hot MXU gather), 2 tiles.
    out = jax.block_until_ready(input_embeddings(x, embedding_table))
    ref = jnp.take(embedding_table, x, axis=0) * math.sqrt(d_model)
    assert out.shape == (batch, seq, d_model)
    assert jnp.allclose(out, ref, atol=1e-5, rtol=1e-5)

    # 2) General HBM-gather path (forced): multi-tile, chunked double-buffered DMA,
    #    ragged last tile with padding (n = 74 tokens, tile = 64 -> 2 tiles).
    x2 = x[:, :37]
    out2 = jax.block_until_ready(
        input_embeddings(x2, embedding_table, block_tokens=64, table_in_vmem=False))
    ref2 = jnp.take(embedding_table, x2, axis=0) * math.sqrt(d_model)
    assert out2.shape == (batch, 37, d_model)
    assert jnp.allclose(out2, ref2, atol=1e-5, rtol=1e-5)

    print("KERNEL_OK")
</pallas_src>

<mosaic_0001>
module attributes {stable_mosaic.version = 11 : i64} {
  func.func @_embed_onehot_kernel(%arg0: i32, %arg1: memref<64x1xi32, #tpu.memory_space<vmem>>, %arg2: memref<256x128xf32, #tpu.memory_space<vmem>>, %arg3: memref<64x128xf32, #tpu.memory_space<vmem>>) attributes {dimension_semantics = [#tpu.dimension_semantics<parallel>], iteration_bounds = array<i64: 2>, scalar_prefetch = 0 : i64, scratch_operands = 0 : i64, tpu.core_type = #tpu.core_type<tc>, window_params = [{transform_indices = @transform_0, window_bounds = array<i64: 64, 1>}, {pipeline_mode = #tpu.pipeline_mode<synchronous>, transform_indices = @transform_1, window_bounds = array<i64: 256, 128>}, {transform_indices = @transform_2, window_bounds = array<i64: 64, 128>}]} {
    %c0 = arith.constant 0 : index
    %c0_0 = arith.constant 0 : index
    %0 = vector.load %arg1[%c0, %c0_0] : memref<64x1xi32, #tpu.memory_space<vmem>>, vector<64x1xi32>
    %1 = tpu.iota {dimensions = array<i32: 1>} : vector<64x256xi32>
    %2 = vector.broadcast %0 : vector<64x1xi32> to vector<64x256xi32>
    %3 = arith.cmpi eq, %1, %2 : vector<64x256xi32>
    %4 = arith.extui %3 : vector<64x256xi1> to vector<64x256xi32>
    %5 = arith.sitofp %4 : vector<64x256xi32> to vector<64x256xf32>
    %c0_1 = arith.constant 0 : index
    %c0_2 = arith.constant 0 : index
    %6 = vector.load %arg2[%c0_1, %c0_2] : memref<256x128xf32, #tpu.memory_space<vmem>>, vector<256x128xf32>
    %cst = arith.constant dense<0.000000e+00> : vector<64x128xf32>
    %7 = tpu.matmul %5, %6, %cst {dimension_numbers = #tpu.dot_dimension_numbers<[1], [0], [0], [1], [0, 0, 1, 1], [], []>} : vector<64x256xf32>, vector<256x128xf32>, vector<64x128xf32> -> vector<64x128xf32>
    %cst_3 = arith.constant 11.3137083 : f32
    %8 = vector.broadcast %cst_3 : f32 to vector<64x128xf32>
    %9 = arith.mulf %7, %8 : vector<64x128xf32>
    %c0_4 = arith.constant 0 : index
    %c0_5 = arith.constant 0 : index
    %10 = vector.load %arg3[%c0_4, %c0_5] : memref<64x128xf32, #tpu.memory_space<vmem>>, vector<64x128xf32>
    tpu.vector_store %arg3[%c0_4, %c0_5], %9 {strides = array<i32>} : memref<64x128xf32, #tpu.memory_space<vmem>>, vector<64x128xf32>,
    return
  }
  func.func @transform_0(%arg0: i32) -> (i32, i32) {
    %c0_i32 = arith.constant 0 : i32
    %c0_i32_0 = arith.constant 0 : i32
    return %arg0, %c0_i32 : i32, i32
  }
  func.func @transform_1(%arg0: i32) -> (i32, i32) {
    %c0_i32 = arith.constant 0 : i32
    %c0_i32_0 = arith.constant 0 : i32
    %c0_i32_1 = arith.constant 0 : i32
    return %c0_i32, %c0_i32_0 : i32, i32
  }
  func.func @transform_2(%arg0: i32) -> (i32, i32) {
    %c0_i32 = arith.constant 0 : i32
    %c0_i32_0 = arith.constant 0 : i32
    return %arg0, %c0_i32 : i32, i32
  }
}

</mosaic_0001>

<bundles_post_ra>
// kernel: tpu_custom_call.1
= control target key start
LH: loop header
LB: loop body
LE: loop exit
PB: predicated region body
PF: predicated region fallthrough
CT: control target
= control target key end

     0   :  { %7 = vsyncpa [#allocation3], 0  ;;  %s936_s0 = inlined_call_operand.vmem [shape: s32[128,1], index: 0, kind: input, shape index: {}]   ;;  %s937_s1 = inlined_call_operand.hbm [shape: f32[256,128], index: 1, kind: input, shape index: {}]   ;;  %s938_s2 = inlined_call_operand.hbm [shape: f32[128,128], index: 2, kind: output, shape index: {}]  }
   0x1   :  { %8 = vsyncpa [#allocation4], 0 }
   0x2   :  { %10 = vsyncpa [#allocation4 + $0x1], 0  ;;  %s792_s9 = smov 0   ;;  %s794_s10 = smov 0  }
   0x3   :  { %s796_s11 = smov 0   ;;  %s798_s12 = smov 0  }
   0x4 LB: > { %s813_s13 = sadd.s32 4294967295, %s767_s12   ;;  %s484_s14 = sadd.s32 4294967294, %s767_s12   ;;  %s767_s12 = sphi %s798_s12, %s946_s12   ;;  %s763_s11 = sphi %s796_s11, %s945_s11   ;;  %s759_s10 = sphi %s794_s10, %s944_s10   ;;  %s755_s9 = sphi %s792_s9, %s943_s9  }
   0x5   : > { %s817_s15 = sadd.s32 1, %s767_s12   ;;  %s70_s16 = sadd.s32 1, %s763_s11 }
   0x6   : > { %s67_s17 = ssub.s32 %s767_s12, %s817_s15  ;;  %p80_p0 = scmp.ne.s32.totalorder %s763_s11, %s759_s10 }
   0x7   : > { %p68_p1 = scmp.eq.s32.totalorder %s67_s17, 0  ;;  %p81_p2 = scmp.eq.s32.totalorder %s813_s13, 1 }
   0x8   : > { %p86_p3 = scmp.ne.s32.totalorder %s759_s10, %s755_s9  ;;  %p87_p4 = scmp.eq.s32.totalorder %s484_s14, 1 }
   0x9   : > { %s828_s18 = scalar_select %p68_p1, %s763_s11, %s70_s16  }
   0xa   : > { %p830_p5 = por %p81_p2, %p80_p0  ;;  %p834_p6 = por %p87_p4, %p86_p3 }
   0xb   : > { %p485_p7 = scmp.ge.s32.totalorder %s767_s12, 1  ;;  %p94_p8 = scmp.lt.s32.totalorder %s767_s12, 3 }
   0xc   : > { %s940_s20 = scalar_select %p834_p6, 1, 0 }
   0xd   : > { %p633_p9 = scmp.eq.s32.totalorder %s813_s13, 0  ;;  %p841_p10 = pnand %p485_p7, %p94_p8 }
   0xe   : > { %s769_s22 = smov [#allocation2]  }
   0xf   : > { %s106_s23 = sshll.u32 %s769_s22, 4  ;;  %p625_p11 = pneg %p841_p10  ;;  %s107_s23 = int_to_ptr.vmem [resolvable:$true] %s106_s23 }
  0x10   : > { %s688_s24 = scalar_lea.vmem %s107_s23, 4096  ;;  %p696_p3 = scmp.lt.s32.totalorder %s107_s23, %s107_s23 }
  0x11   : > { %p626_p12 = pnand %p633_p9, %p625_p11  ;;  %p689_p0 = scmp.ne.s32.totalorder %s107_s23, %s688_s24 }
  0x12   : > { %p697_p4 = scmp.lt.s32.totalorder %s688_s24, %s688_s24 }
  0x13   : > { %p679_p13 = pneg %p626_p12 }
  0x14   : > { %p698_p6 = por %p697_p4, %p696_p3 }
  0x15   : > { %p691_p1 = pnand %p689_p0, %p679_p13 }
  0x17   : > { %p692_p2 = pneg %p691_p1 }
  0x19   : > { %p699_p7 = pnand %p698_p6, %p692_p2 }
  0x1b   : > { %702 = shalt.err (!%p699_p7)
}
  0x1c   : > { %s770_s25 = smov 128   ;;  %s771_s26 = smov 8  }
  0x1d   : > { %628 = dma.hbm_to_vmem [thread:$0]  (!%p626_p12), %s937_s1, 4096, %s107_s23, [#allocation3], %s770_s25, %s770_s25, %s771_s26  }
  0x1e   : > { %131 = sbr.rel (%p841_p10) target bundleno = 398 (0x18e), region = 28 }
  0x23   : > { %746 = dma.done.wait (%p633_p9), [#allocation3], 4096  }
  0x24   : > { %748 = vsyncadd (%p633_p9), [#allocation3], 4294963200  ;;  %s491_s29 = sshll.u32 %s813_s13, 3  ;;  %v772_v0 = vmov 0   ;;  %v274_v5 = vld [vmem:[#allocation2 + $0xf8] sm:$0xff]  ;;  %v273_v7 = vld [vmem:[#allocation2 + $0xf0] sm:$0xff]  ;;  %v168_v41 = vlaneseq }
  0x25   : > { %676 = vset.pattern.permute.xlu1 %v772_v0  ;;  %675 = vset.pattern.permute.xlu0 %v772_v0  ;;  %p154_p6 = scmp.lt.s32.totalorder %s491_s29, 15  ;;  %v258_v6 = vld [vmem:[#allocation2 + $0x78] sm:$0xff]  ;;  %v257_v8 = vld [vmem:[#allocation2 + $0x70] sm:$0xff]  ;;  %v272_v9 = vld [vmem:[#allocation2 + $0xe8] sm:$0xff]  ;;  %v773_v46 = vmov 1.0   ;;  %s150_s6 = sand.u32 1, %s759_s10  }
  0x26   : > { %531 = vmatprep.subr.mxu0 %v274_v5  ;;  %587 = vmatprep.subr.mxu1 %v274_v5  ;;  %v256_v12 = vld [vmem:[#allocation2 + $0x68] sm:$0xff]  ;;  %v271_v13 = vld [vmem:[#allocation2 + $0xe0] sm:$0xff]  ;;  %v270_v17 = vld [vmem:[#allocation2 + $0xd8] sm:$0xff]  ;;  %v169_v42 = vand.u32 127, %v168_v41  ;;  %s490_s7 = sshll.u32 %s150_s6, 6  ;;  %s530_s16 = sshll.u32 %s813_s13, 10 }
  0x27   : > { %s948_s29 = smov (!%p154_p6, %s491_s29), 15  ;;  %532 = vmatpush3.msra.mxu0 %v258_v6  ;;  %603 = vmatpush3.msra.mxu1 %v258_v6  ;;  %v255_v14 = vld [vmem:[#allocation2 + $0x60] sm:$0xff]  ;;  %v254_v18 = vld [vmem:[#allocation2 + $0x58] sm:$0xff]  ;;  %v269_v19 = vld [vmem:[#allocation2 + $0xd0] sm:$0xff]  ;;  %s875_s8 = scalar_lea.vmem [#allocation5], %s490_s7 }
  0x28   : > { %s492_s30 = sshll.u32 %s948_s29, 3  ;;  %533 = vmatprep.subr.mxu0 %v273_v7  ;;  %588 = vmatprep.subr.mxu1 %v273_v7  ;;  %v253_v20 = vld [vmem:[#allocation2 + $0x50] sm:$0xff]  ;;  %v268_v21 = vld [vmem:[#allocation2 + $0xc8] sm:$0xff]  ;;  %v267_v23 = vld [vmem:[#allocation2 + $0xc0] sm:$0xff]  ;;  %v170_v43 = vadd.s32 128, %v169_v42  ;;  %s410_s14 = sshll.u32 %s875_s8, 4  ;;  %s886_s14 = int_to_ptr.vmem [resolvable:$true] %s410_s14 }
  0x29   : > { %s862_s5 = scalar_lea.vmem %s936_s0, %s492_s30  ;;  %534 = vmatpush3.msra.mxu0 %v257_v8  ;;  %604 = vmatpush3.msra.mxu1 %v257_v8  ;;  %v252_v22 = vld [vmem:[#allocation2 + $0x48] sm:$0xff]  ;;  %v251_v24 = vld [vmem:[#allocation2 + $0x40] sm:$0xff]  ;;  %v266_v25 = vld [vmem:[#allocation2 + $0xb8] sm:$0xff]  ;;  %s891_s22 = scalar_lea.hbm %s938_s2, %s530_s16 }
  0x2a   : > { %v161_v1 = vld [vmem:[%s862_s5 + $0x8] sm:$0xff]  ;;  %v160_v2 = vld [vmem:[%s862_s5] sm:$0xff]  ;;  %v166_v10 = vld [vmem:[%s862_s5 + $0x30] sm:$0xff]  ;;  %535 = vmatprep.subr.mxu0 %v272_v9  ;;  %589 = vmatprep.subr.mxu1 %v272_v9  ;;  %s896_s23 = scalar_lea.sflag [#allocation4], %s150_s6  ;;  %s703_s13 = scalar_lea.vmem %s886_s14, 1024 }
  0x2b   : > { %175 = vperm.xlu1 %676, %v161_v1   ;;  %172 = vperm.xlu0 %675, %v160_v2   ;;  %v165_v3 = vld [vmem:[%s862_s5 + $0x28] sm:$0xff]  ;;  %v164_v4 = vld [vmem:[%s862_s5 + $0x20] sm:$0xff]  ;;  %v162_v11 = vld [vmem:[%s862_s5 + $0x10] sm:$0xff]  ;;  %p704_p8 = scmp.ne.s32.totalorder %s886_s14, %s703_s13  ;;  %s774_s24 = smov [#allocation5]  }
  0x2c   : > { %v167_v15 = vld [vmem:[%s862_s5 + $0x38] sm:$0xff]  ;;  %536 = vmatpush3.msra.mxu0 %v256_v12  ;;  %605 = vmatpush3.msra.mxu1 %v256_v12  ;;  %v265_v27 = vld [vmem:[#allocation2 + $0xb0] sm:$0xff]  ;;  %v264_v29 = vld [vmem:[#allocation2 + $0xa8] sm:$0xff]  ;;  %s707_s25 = sshll.u32 %s774_s24, 4  ;;  %s708_s25 = int_to_ptr.vmem [resolvable:$false] %s707_s25 }
  0x2d   : > { %v163_v16 = vld [vmem:[%s862_s5 + $0x18] sm:$0xff]  ;;  %537 = vmatprep.subr.mxu0 %v271_v13  ;;  %590 = vmatprep.subr.mxu1 %v271_v13  ;;  %v249_v28 = vld [vmem:[#allocation2 + $0x30] sm:$0xff]  ;;  %v248_v30 = vld [vmem:[#allocation2 + $0x28] sm:$0xff]  ;;  %p705_p9 = pnand %p704_p8, %p830_p5  ;;  %s709_s26 = scalar_lea.vmem %s708_s25, 2048 }
  0x2e   : > { %538 = vmatpush3.msra.mxu0 %v255_v14  ;;  %606 = vmatpush3.msra.mxu1 %v255_v14  ;;  %v250_v26 = vld [vmem:[#allocation2 + $0x38] sm:$0xff]  ;;  %v263_v31 = vld [vmem:[#allocation2 + $0xa0] sm:$0xff]  ;;  %v261_v35 = vld [vmem:[#allocation2 + $0x90] sm:$0xff]  ;;  %p710_p11 = scmp.lt.s32.totalorder %s886_s14, %s708_s25  ;;  %p711_p12 = scmp.lt.s32.totalorder %s709_s26, %s703_s13 }
  0x2f   : > { %187 = vperm.xlu1 %676, %v165_v3   ;;  %184 = vperm.xlu0 %675, %v164_v4   ;;  %v247_v32 = vld [vmem:[#allocation2 + $0x20] sm:$0xff]  ;;  %v262_v33 = vld [vmem:[#allocation2 + $0x98] sm:$0xff]  ;;  %v245_v36 = vld [vmem:[#allocation2 + $0x10] sm:$0xff]  ;;  %p706_p10 = pneg %p705_p9 }
  0x30   : > { %539 = vmatprep.subr.mxu0 %v270_v17  ;;  %591 = vmatprep.subr.mxu1 %v270_v17  ;;  %v246_v34 = vld [vmem:[#allocation2 + $0x18] sm:$0xff]  ;;  %v260_v37 = vld [vmem:[#allocation2 + $0x88] sm:$0xff]  ;;  %v259_v39 = vld [vmem:[#allocation2 + $0x80] sm:$0xff]  ;;  %p712_p13 = por %p711_p12, %p710_p11 }
  0x31   : > { %540 = vmatpush3.msra.mxu0 %v254_v18  ;;  %607 = vmatpush3.msra.mxu1 %v254_v18  ;;  %v244_v38 = vld [vmem:[#allocation2 + $0x8] sm:$0xff]  ;;  %v243_v40 = vld [vmem:[#allocation2] sm:$0xff] }
  0x32   : > { %541 = vmatprep.subr.mxu0 %v269_v19  ;;  %592 = vmatprep.subr.mxu1 %v269_v19  ;;  %p713_p0 = pnand %p712_p13, %p706_p10 }
  0x33   : > { %190 = vperm.xlu1 %676, %v166_v10   ;;  %178 = vperm.xlu0 %675, %v162_v11  }
  0x34   : > { %542 = vmatpush3.msra.mxu0 %v253_v20  ;;  %608 = vmatpush3.msra.mxu1 %v253_v20 }
  0x35   : > { %543 = vmatprep.subr.mxu0 %v268_v21  ;;  %593 = vmatprep.subr.mxu1 %v268_v21 }
  0x36   : > { %544 = vmatpush3.msra.mxu0 %v252_v22  ;;  %609 = vmatpush3.msra.mxu1 %v252_v22 }
  0x37   : > { %193 = vperm.xlu1 %676, %v167_v15   ;;  %181 = vperm.xlu0 %675, %v163_v16  }
  0x38   : > { %545 = vmatprep.subr.mxu0 %v267_v23  ;;  %594 = vmatprep.subr.mxu1 %v267_v23 }
  0x39   : > { %546 = vmatpush3.msra.mxu0 %v251_v24  ;;  %610 = vmatpush3.msra.mxu1 %v251_v24 }
  0x3a   : > { %547 = vmatprep.subr.mxu0 %v266_v25  ;;  %595 = vmatprep.subr.mxu1 %v266_v25 }
  0x3b   : > { %548 = vmatpush3.msra.mxu0 %v250_v26  ;;  %611 = vmatpush3.msra.mxu1 %v250_v26 }
  0x3c   : > { %549 = vmatprep.subr.mxu0 %v265_v27  ;;  %596 = vmatprep.subr.mxu1 %v265_v27 }
  0x3d   : > { %550 = vmatpush3.msra.mxu0 %v249_v28  ;;  %612 = vmatpush3.msra.mxu1 %v249_v28 }
  0x3e   : > { %551 = vmatprep.subr.mxu0 %v264_v29  ;;  %597 = vmatprep.subr.mxu1 %v264_v29 }
  0x3f   : > { %552 = vmatpush3.msra.mxu0 %v248_v30  ;;  %613 = vmatpush3.msra.mxu1 %v248_v30 }
  0x40   : > { %553 = vmatprep.subr.mxu0 %v263_v31  ;;  %598 = vmatprep.subr.mxu1 %v263_v31 }
  0x41   : > { %554 = vmatpush3.msra.mxu0 %v247_v32  ;;  %614 = vmatpush3.msra.mxu1 %v247_v32 }
  0x42   : > { %555 = vmatprep.subr.mxu0 %v262_v33  ;;  %599 = vmatprep.subr.mxu1 %v262_v33 }
  0x43   : > { %556 = vmatpush3.msra.mxu0 %v246_v34  ;;  %615 = vmatpush3.msra.mxu1 %v246_v34 }
  0x44   : > { %557 = vmatprep.subr.mxu0 %v261_v35  ;;  %600 = vmatprep.subr.mxu1 %v261_v35 }
  0x45   : > { %558 = vmatpush3.msra.mxu0 %v245_v36  ;;  %616 = vmatpush3.msra.mxu1 %v245_v36 }
  0x46   : > { %559 = vmatprep.subr.mxu0 %v260_v37  ;;  %601 = vmatprep.subr.mxu1 %v260_v37 }
  0x47   : > { %560 = vmatpush3.msra.mxu0 %v244_v38  ;;  %617 = vmatpush3.msra.mxu1 %v244_v38 }
  0x48   : > { %561 = vmatprep.subr.mxu0 %v259_v39  ;;  %602 = vmatprep.subr.mxu1 %v259_v39 }
  0x49   : > { %562 = vmatpush3.msra.mxu0 %v243_v40  ;;  %618 = vmatpush3.msra.mxu1 %v243_v40 }
  0xa6   : > { %v176_v44 = vpop.permute.xlu1 %175  ;;  %v173_v45 = vpop.permute.xlu0 %172 }
  0xa7   : > { %vm198_vm0 = vcmp.eq.s32.totalorder %v170_v43, %v176_v44  ;;  %vm195_vm1 = vcmp.eq.s32.totalorder %v169_v42, %v173_v45  ;;  %vm196_vm2 = vcmp.eq.s32.totalorder %v170_v43, %v173_v45  ;;  %vm197_vm3 = vcmp.eq.s32.totalorder %v169_v42, %v176_v44 }
  0xa8   : > { %509 = vmatprep.mubr.msk.f32.mxu0 %vm196_vm2, %v773_v46 }
  0xa9   : > { %510 = vmatmul.mubr.msk.f32.vlgmr.msra.gmra.mxu0 %vm195_vm1, %v773_v46 }
  0xaa   : > { %v188_v47 = vpop.permute.xlu1 %187  ;;  %v185_v48 = vpop.permute.xlu0 %184  ;;  %511 = vmatprep.mubr.msk.f32.mxu0 %vm198_vm0, %v773_v46 }
  0xab   : > { %vm203_vm4 = vcmp.eq.s32.totalorder %v169_v42, %v185_v48  ;;  %vm204_vm5 = vcmp.eq.s32.totalorder %v170_v43, %v185_v48  ;;  %vm206_vm6 = vcmp.eq.s32.totalorder %v170_v43, %v188_v47  ;;  %vm205_vm9 = vcmp.eq.s32.totalorder %v169_v42, %v188_v47 }
  0xac   : > { %517 = vmatprep.mubr.msk.f32.mxu1 %vm204_vm5, %v773_v46 }
  0xad   : > { %512 = vmatmul.mubr.msk.f32.gmra.mxu0 %vm197_vm3, %v773_v46  ;;  %518 = vmatmul.mubr.msk.f32.vlgmr.msra.gmra.mxu1 %vm203_vm4, %v773_v46 }
  0xae   : > { %v191_v49 = vpop.permute.xlu1 %190  ;;  %519 = vmatprep.mubr.msk.f32.mxu1 %vm206_vm6, %v773_v46  ;;  %v179_v50 = vpop.permute.xlu0 %178 }
  0xaf   : > { %vm199_vm7 = vcmp.eq.s32.totalorder %v169_v42, %v179_v50  ;;  %vm200_vm8 = vcmp.eq.s32.totalorder %v170_v43, %v179_v50  ;;  %vm208_vm10 = vcmp.eq.s32.totalorder %v170_v43, %v191_v49  ;;  %vm207_vm13 = vcmp.eq.s32.totalorder %v169_v42, %v191_v49 }
  0xb0   : > { %513 = vmatprep.mubr.msk.f32.mxu0 %vm200_vm8, %v773_v46 }
  0xb1   : > { %514 = vmatmul.mubr.msk.f32.gmra.mxu0 %vm199_vm7, %v773_v46  ;;  %520 = vmatmul.mubr.msk.f32.gmra.mxu1 %vm205_vm9, %v773_v46 }
  0xb2   : > { %v194_v51 = vpop.permute.xlu1 %193  ;;  %521 = vmatprep.mubr.msk.f32.mxu1 %vm208_vm10, %v773_v46  ;;  %v182_v52 = vpop.permute.xlu0 %181 }
  0xb3   : > { %vm201_vm11 = vcmp.eq.s32.totalorder %v169_v42, %v182_v52  ;;  %vm202_vm12 = vcmp.eq.s32.totalorder %v170_v43, %v182_v52  ;;  %vm210_vm14 = vcmp.eq.s32.totalorder %v170_v43, %v194_v51  ;;  %vm209_vm15 = vcmp.eq.s32.totalorder %v169_v42, %v194_v51 }
  0xb4   : > { %515 = vmatprep.mubr.msk.f32.mxu0 %vm202_vm12, %v773_v46 }
  0xb5   : > { %516 = vmatmul.mubr.msk.f32.gmra.mxu0 %vm201_vm11, %v773_v46  ;;  %522 = vmatmul.mubr.msk.f32.gmra.mxu1 %vm207_vm13, %v773_v46 }
  0xb6   : > { %523 = vmatprep.mubr.msk.f32.mxu1 %vm210_vm14, %v773_v46 }
  0xb9   : > { %524 = vmatmul.mubr.msk.f32.gmra.mxu1 %vm209_vm15, %v773_v46 }
 0x169   : > { %v563_v53 = vpop.f32.mrf.mxu0 }
 0x16b   : > { %v564_v54 = vpop.f32.mrf.mxu0 }
 0x16c   : > { %v565_v55 = vadd.f32 %v564_v54, %v563_v53 }
 0x16d   : > { %v566_v56 = vpop.f32.mrf.mxu0  ;;  %v575_v57 = vpop.f32.mrf.mxu1 }
 0x16e   : > { %v380_v58 = vmul.f32 11.313708, %v565_v55 }
 0x16f   : > { %v567_v59 = vpop.f32.mrf.mxu0  ;;  %v576_v60 = vpop.f32.mrf.mxu1 }
 0x170   : > { %388 = vst [vmem:[%s875_s8] sm:$0xff] %v380_v58  ;;  %v568_v61 = vadd.f32 %v567_v59, %v566_v56  ;;  %v577_v62 = vadd.f32 %v576_v60, %v575_v57 }
 0x171   : > { %v569_v63 = vpop.f32.mrf.mxu0  ;;  %v578_v0 = vpop.f32.mrf.mxu1 }
 0x172   : > { %v381_v1 = vmul.f32 11.313708, %v568_v61  ;;  %v384_v2 = vmul.f32 11.313708, %v577_v62 }
 0x173   : > { %v570_v3 = vpop.f32.mrf.mxu0  ;;  %v579_v4 = vpop.f32.mrf.mxu1 }
 0x174   : > { %389 = vst [vmem:[%s875_s8 + $0x8] sm:$0xff] %v381_v1  ;;  %392 = vst [vmem:[%s875_s8 + $0x20] sm:$0xff] %v384_v2  ;;  %v571_v5 = vadd.f32 %v570_v3, %v569_v63  ;;  %v580_v6 = vadd.f32 %v579_v4, %v578_v0 }
 0x175   : > { %v572_v7 = vpop.f32.mrf.mxu0  ;;  %v581_v8 = vpop.f32.mrf.mxu1 }
 0x176   : > { %v382_v9 = vmul.f32 11.313708, %v571_v5  ;;  %v385_v10 = vmul.f32 11.313708, %v580_v6 }
 0x177   : > { %v573_v11 = vpop.f32.mrf.mxu0  ;;  %v582_v12 = vpop.f32.mrf.mxu1 }
 0x178   : > { %390 = vst [vmem:[%s875_s8 + $0x10] sm:$0xff] %v382_v9  ;;  %393 = vst [vmem:[%s875_s8 + $0x28] sm:$0xff] %v385_v10  ;;  %v574_v13 = vadd.f32 %v573_v11, %v572_v7  ;;  %v583_v14 = vadd.f32 %v582_v12, %v581_v8 }
 0x179   : > { %v584_v15 = vpop.f32.mrf.mxu1 }
 0x17a   : > { %v383_v16 = vmul.f32 11.313708, %v574_v13  ;;  %v386_v17 = vmul.f32 11.313708, %v583_v14 }
 0x17b   : > { %v585_v18 = vpop.f32.mrf.mxu1 }
 0x17c   : > { %391 = vst [vmem:[%s875_s8 + $0x18] sm:$0xff] %v383_v16  ;;  %394 = vst [vmem:[%s875_s8 + $0x30] sm:$0xff] %v386_v17  ;;  %v586_v19 = vadd.f32 %v585_v18, %v584_v15 }
 0x17e   : > { %v387_v20 = vmul.f32 11.313708, %v586_v19 }
 0x180   : > { %395 = vst [vmem:[%s875_s8 + $0x38] sm:$0xff] %v387_v20 }
 0x181   : > { %716 = shalt.err (!%p713_p0)
}
 0x182   : > { %s717_s27 = scalar_lea.hbm %s891_s22, 1024  ;;  %s721_s30 = scalar_lea.hbm %s938_s2, 2048 }
 0x183   : > { %p718_p1 = scmp.ne.s32.totalorder %s891_s22, %s717_s27  ;;  %p722_p4 = scmp.lt.s32.totalorder %s891_s22, %s938_s2 }
 0x184   : > { %p723_p7 = scmp.lt.s32.totalorder %s721_s30, %s717_s27 }
 0x185   : > { %p719_p2 = pnand %p718_p1, %p830_p5 }
 0x186   : > { %p724_p6 = por %p723_p7, %p722_p4 }
 0x187   : > { %p720_p3 = pneg %p719_p2 }
 0x189   : > { %p725_p8 = pnand %p724_p6, %p720_p3 }
 0x18b   : > { %728 = shalt.err (!%p725_p8)
}
 0x18c   : > { %s775_s5 = smov 128   ;;  %s776_s6 = smov 8  }
 0x18d   : > { %623 = dma.vmem_to_hbm [thread:$0]  (%p830_p5), %s886_s14, 1024, %s891_s22, %s896_s23, %s775_s5, %s775_s5, %s776_s6  }
 0x18e PF: > { %p635_p9 = scmp.ge.s32.totalorder %s767_s12, 2  ;;  %s425_s7 = sand.u32 1, %s755_s9  }
 0x18f   : > { %p942_p10 = scmp.ne.s32.totalorder %s940_s20, 0  ;;  %s426_s8 = scalar_lea.sflag [#allocation4], %s425_s7 }
 0x191   : > { %p630_p11 = pnand %p635_p9, %p942_p10 }
 0x193   : > { %p631_p12 = pneg %p630_p11 }
 0x195   : > { %750 = dma.done.wait (%p631_p12), %s426_s8, 1024  }
 0x196   : > { %752 = vsyncadd (%p631_p12), %s426_s8, 4294966272  ;;  %p13_p13 = scmp.ge.s32.totalorder %s817_s15, 4   ;;  %s943_s9 = smov %s759_s10 }
 0x197   : > { %s944_s10 = smov %s763_s11  ;;  %s945_s11 = smov %s828_s18 }
 0x198   : > { %s946_s12 = smov %s817_s15  ;;  %15 = sbr.rel (!%p13_p13) target bundleno = 4 (0x4), region = 68 }
 0x19d   :  { %431 = vsyncpa [#allocation3], 1 }
 0x19e   :  { %433 = vsyncpa [#allocation3 + $0x1], 1 }
 0x19f   :  { %434 = vsyncpa [#allocation4], 1 }
 0x1a0   :  { %436 = vsyncpa [#allocation4 + $0x1], 1 }

</bundles_post_ra>
